<compile_context>
chip_gen: v6e
topology: v6e:2x2x1
jax: 0.10.0
libtpu: 0.0.40
codegen_flags: <defaults>
</compile_context>

<pallas_src>
import functools

import jax
import jax.numpy as jnp
import numpy as np
from jax.experimental import pallas as pl
from jax.experimental.pallas import tpu as pltpu


# ------------------------------- kernels -----------------------------------

def _kernel_single_k(x_ref, w_ref, b_ref, o_ref, *, precision):
    # x_ref : (tm, K)  VMEM input tile
    # w_ref : (tn, K)  VMEM weight tile (PyTorch layout, contracted on dim 1)
    # b_ref : (1,  tn) VMEM bias tile
    # o_ref : (tm, tn) VMEM output tile
    xa = jnp.maximum(x_ref[...], 0)                     # pre-activation ReLU (VPU)
    acc = jax.lax.dot_general(
        xa, w_ref[...],
        dimension_numbers=(((1,), (1,)), ((), ())),      # contract K of both
        preferred_element_type=jnp.float32,
        precision=precision)
    o_ref[...] = (acc + b_ref[...].astype(jnp.float32)).astype(o_ref.dtype)


def _kernel_multi_k(x_ref, w_ref, b_ref, o_ref, acc_ref, *, precision):
    # Same as above plus an f32 VMEM accumulator over the K grid axis.
    k = pl.program_id(2)

    @pl.when(k == 0)
    def _():
        acc_ref[...] = jnp.zeros_like(acc_ref)

    xa = jnp.maximum(x_ref[...], 0)
    acc_ref[...] += jax.lax.dot_general(
        xa, w_ref[...],
        dimension_numbers=(((1,), (1,)), ((), ())),
        preferred_element_type=jnp.float32,
        precision=precision)

    @pl.when(k == pl.num_programs(2) - 1)
    def _():
        o_ref[...] = (acc_ref[...] + b_ref[...].astype(jnp.float32)).astype(
            o_ref.dtype)


# ------------------------------ tile logic ----------------------------------

def _round_up(x, m):
    return -(-x // m) * m


def _chip_config():
    """Per-generation preferred tiles / VMEM capacity / #TensorCores."""
    kind = ""
    try:
        kind = jax.devices()[0].device_kind.lower()
    except Exception:
        pass
    vmem_cap = None
    try:
        vmem_cap = int(pltpu.get_tpu_info().vmem_capacity_bytes)
    except Exception:
        pass

    if "v6" in kind:                          # v6e: ridge ~656 flop/byte
        tm = tn = 1024
        vmem_cap = vmem_cap or (128 << 20)
        two_core = False
    elif "v5" in kind:                        # v5e/v5p: ridge ~240 flop/byte
        tm = tn = 512
        vmem_cap = vmem_cap or (128 << 20)
        two_core = False
    elif "v7" in kind or "7x" in kind:        # v7x: 64 MiB VMEM, ridge ~311
        tm = tn = 768
        vmem_cap = vmem_cap or (64 << 20)
        two_core = True
    else:                                     # unknown: infer from VMEM size
        vmem_cap = vmem_cap or (128 << 20)
        if vmem_cap <= (64 << 20):
            tm = tn = 768
            two_core = True
        else:
            tm = tn = 512
            two_core = False
    tk = 1024
    return tm, tn, tk, vmem_cap, two_core


def _choose_tile(dim, align, pref):
    """Pick a tile (multiple of `align`, <= pref) minimizing padding of `dim`.

    Returns (tile, padded_dim) with padded_dim % tile == 0. Never falls back
    to a huge "full dimension" block, and never produces a <128 lane width
    when align=128.
    """
    pref = max(align, (pref // align) * align)
    aligned = _round_up(dim, align)
    if aligned <= pref:
        return aligned, aligned
    best_t, best_pad = align, aligned
    for t in range(align, pref + 1, align):
        pad = _round_up(dim, t)
        if pad < best_pad or (pad == best_pad and t > best_t):
            best_t, best_pad = t, pad
    return best_t, best_pad


# -------------------------------- wrapper -----------------------------------

def linear_block(x, weight, bias, *, tm=None, tn=None, tk=None):
    """LinearBlock forward: relu(x) @ weight.T + bias.

    x: (..., C_in) ; weight: (C_out, C_in) ; bias: (C_out,)
    For peak MXU throughput pass bf16 x / weight; f32 inputs are computed at
    precision=HIGHEST for parity with the f32 PyTorch reference.
    """
    orig_shape = x.shape
    K = orig_shape[-1]
    x2 = x.reshape(-1, K)
    M = x2.shape[0]
    N, K2 = weight.shape
    assert K == K2, (x.shape, weight.shape)

    pref_tm, pref_tn, pref_tk, vmem_cap, two_core = _chip_config()
    if tm is not None:
        pref_tm = tm
    if tn is not None:
        pref_tn = tn
    if tk is not None:
        pref_tk = tk

    in_b = jnp.dtype(x.dtype).itemsize
    w_b = jnp.dtype(weight.dtype).itemsize
    out_b = in_b
    budget = max(vmem_cap - (16 << 20), 24 << 20)   # leave headroom for Mosaic

    tm_, M_pad = _choose_tile(M, 8, pref_tm)
    tn_, N_pad = _choose_tile(N, 128, pref_tn)

    def footprint(tk_, with_acc):
        f = 2 * (tm_ * tk_ * in_b + tn_ * tk_ * w_b + tn_ * 4)  # double-buffered ins
        f += 2 * tm_ * tn_ * out_b                               # double-buffered out
        if with_acc:
            f += tm_ * tn_ * 4
        return f

    # Collapse the reduction axis when the full-K tiles fit VMEM (typical
    # for LinearBlock): no acc scratch, no per-step grid overhead.
    single_k = footprint(K, False) <= budget
    if single_k:
        tk_, K_pad = K, K
    else:
        cand = max(128, (pref_tk // 128) * 128)
        while cand > 128 and footprint(cand, True) > budget:
            cand -= 128
        tk_, K_pad = _choose_tile(K, 128, cand)

    # v7x: make sure the parallel grid has >= 2 tiles so both TCs get work.
    if two_core and (M_pad // tm_) * (N_pad // tn_) < 2:
        if tm_ >= 16 and (tm_ // 2) % 8 == 0:
            tm_ //= 2
        elif tn_ >= 256 and (tn_ // 2) % 128 == 0:
            tn_ //= 2

    # Zero-pad to tile multiples (relu(0)=0 and zero weight rows/cols add 0,
    # so padding is exact; padded rows/cols are sliced off below).
    if M_pad != M:
        x2 = jnp.pad(x2, ((0, M_pad - M), (0, 0)))
    if K_pad != K:
        x2 = jnp.pad(x2, ((0, 0), (0, K_pad - K)))
        weight = jnp.pad(weight, ((0, 0), (0, K_pad - K)))
    if N_pad != N:
        weight = jnp.pad(weight, ((0, N_pad - N), (0, 0)))
        bias = jnp.pad(bias, (0, N_pad - N))
    b2 = bias.reshape(1, N_pad)

    f32_in = (jnp.dtype(x.dtype) == jnp.float32
              or jnp.dtype(weight.dtype) == jnp.float32)
    precision = jax.lax.Precision.HIGHEST if f32_in else None

    fp = footprint(tk_, not single_k)
    vmem_limit = int(min(vmem_cap - (8 << 20), max(fp + (4 << 20), 32 << 20)))

    cost = pl.CostEstimate(
        flops=2 * M_pad * N_pad * K_pad,
        transcendentals=0,
        bytes_accessed=(M_pad * K_pad * in_b + N_pad * K_pad * w_b
                        + M_pad * N_pad * out_b + N_pad * 4))

    if single_k:
        grid = (M_pad // tm_, N_pad // tn_)
        out_p = pl.pallas_call(
            functools.partial(_kernel_single_k, precision=precision),
            out_shape=jax.ShapeDtypeStruct((M_pad, N_pad), x.dtype),
            grid_spec=pltpu.PrefetchScalarGridSpec(
                num_scalar_prefetch=0,
                grid=grid,
                in_specs=[
                    pl.BlockSpec((tm_, K_pad), lambda i, j: (i, 0)),
                    pl.BlockSpec((tn_, K_pad), lambda i, j: (j, 0)),
                    pl.BlockSpec((1, tn_), lambda i, j: (0, j)),
                ],
                out_specs=pl.BlockSpec((tm_, tn_), lambda i, j: (i, j)),
                scratch_shapes=[],
            ),
            compiler_params=pltpu.CompilerParams(
                dimension_semantics=("parallel", "parallel"),
                vmem_limit_bytes=vmem_limit,
            ),
            cost_estimate=cost,
        )(x2, weight, b2)
    else:
        grid = (M_pad // tm_, N_pad // tn_, K_pad // tk_)
        out_p = pl.pallas_call(
            functools.partial(_kernel_multi_k, precision=precision),
            out_shape=jax.ShapeDtypeStruct((M_pad, N_pad), x.dtype),
            grid_spec=pltpu.PrefetchScalarGridSpec(
                num_scalar_prefetch=0,
                grid=grid,
                in_specs=[
                    pl.BlockSpec((tm_, tk_), lambda i, j, k: (i, k)),
                    pl.BlockSpec((tn_, tk_), lambda i, j, k: (j, k)),
                    pl.BlockSpec((1, tn_), lambda i, j, k: (0, j)),
                ],
                out_specs=pl.BlockSpec((tm_, tn_), lambda i, j, k: (i, j)),
                scratch_shapes=[pltpu.VMEM((tm_, tn_), jnp.float32)],
            ),
            compiler_params=pltpu.CompilerParams(
                dimension_semantics=("parallel", "parallel", "arbitrary"),
                vmem_limit_bytes=vmem_limit,
            ),
            cost_estimate=cost,
        )(x2, weight, b2)

    out = out_p
    if M_pad != M or N_pad != N:
        out = out[:M, :N]
    return out.reshape(orig_shape[:-1] + (N,))


def linear_block_reference(x, weight, bias):
    """Plain-JAX reference matching the PyTorch module (default config)."""
    xa = jnp.maximum(x, 0.0)
    return xa @ weight.T + bias


if __name__ == "__main__":
    key = jax.random.PRNGKey(0)
    kx, kw, kb = jax.random.split(key, 3)

    # Small shapes consistent with LinearBlock: batch rows x C_in -> C_out.
    M, C_in, C_out = 8, 32, 64
    x = jax.random.normal(kx, (M, C_in), dtype=jnp.float32)
    weight = 0.1 * jax.random.normal(kw, (C_out, C_in), dtype=jnp.float32)
    bias = 0.1 * jax.random.normal(kb, (C_out,), dtype=jnp.float32)

    out = linear_block(x, weight, bias)
    out = jax.block_until_ready(out)

    ref = linear_block_reference(x, weight, bias)
    np.testing.assert_allclose(np.asarray(out), np.asarray(ref),
                               rtol=1e-5, atol=1e-5)
    print("KERNEL_OK")
</pallas_src>

<mosaic_0001>
module attributes {stable_mosaic.version = 11 : i64} {
  func.func @_kernel_single_k(%arg0: i32, %arg1: i32, %arg2: memref<8x32xf32, #tpu.memory_space<vmem>>, %arg3: memref<128x32xf32, #tpu.memory_space<vmem>>, %arg4: memref<1x128xf32, #tpu.memory_space<vmem>>, %arg5: memref<8x128xf32, #tpu.memory_space<vmem>>) attributes {dimension_semantics = [#tpu.dimension_semantics<parallel>, #tpu.dimension_semantics<parallel>], iteration_bounds = array<i64: 1, 1>, scalar_prefetch = 0 : i64, scratch_operands = 0 : i64, tpu.core_type = #tpu.core_type<tc>, window_params = [{transform_indices = @transform_0, window_bounds = array<i64: 8, 32>}, {transform_indices = @transform_1, window_bounds = array<i64: 128, 32>}, {transform_indices = @transform_2, window_bounds = array<i64: 1, 128>}, {transform_indices = @transform_3, window_bounds = array<i64: 8, 128>}]} {
    %c0 = arith.constant 0 : index
    %c0_0 = arith.constant 0 : index
    %0 = vector.load %arg2[%c0, %c0_0] : memref<8x32xf32, #tpu.memory_space<vmem>>, vector<8x32xf32>
    %cst = arith.constant 0.000000e+00 : f32
    %1 = vector.broadcast %cst : f32 to vector<8x32xf32>
    %2 = arith.maximumf %0, %1 : vector<8x32xf32>
    %c0_1 = arith.constant 0 : index
    %c0_2 = arith.constant 0 : index
    %3 = vector.load %arg3[%c0_1, %c0_2] : memref<128x32xf32, #tpu.memory_space<vmem>>, vector<128x32xf32>
    %cst_3 = arith.constant dense<0.000000e+00> : vector<8x128xf32>
    %4 = tpu.matmul %2, %3, %cst_3 {dimension_numbers = #tpu.dot_dimension_numbers<[1], [1], [0], [0], [0, 0, 1, 0], [], []>, precision = #tpu.contract_precision<fp32>} : vector<8x32xf32>, vector<128x32xf32>, vector<8x128xf32> -> vector<8x128xf32>
    %c0_4 = arith.constant 0 : index
    %c0_5 = arith.constant 0 : index
    %5 = vector.load %arg4[%c0_4, %c0_5] : memref<1x128xf32, #tpu.memory_space<vmem>>, vector<1x128xf32>
    %6 = vector.broadcast %5 : vector<1x128xf32> to vector<8x128xf32>
    %7 = arith.addf %4, %6 : vector<8x128xf32>
    %c0_6 = arith.constant 0 : index
    %c0_7 = arith.constant 0 : index
    %8 = vector.load %arg5[%c0_6, %c0_7] : memref<8x128xf32, #tpu.memory_space<vmem>>, vector<8x128xf32>
    tpu.vector_store %arg5[%c0_6, %c0_7], %7 {strides = array<i32>} : memref<8x128xf32, #tpu.memory_space<vmem>>, vector<8x128xf32>,
    return
  }
  func.func @transform_0(%arg0: i32, %arg1: i32) -> (i32, i32) {
    %c0_i32 = arith.constant 0 : i32
    %c0_i32_0 = arith.constant 0 : i32
    return %arg0, %c0_i32 : i32, i32
  }
  func.func @transform_1(%arg0: i32, %arg1: i32) -> (i32, i32) {
    %c0_i32 = arith.constant 0 : i32
    %c0_i32_0 = arith.constant 0 : i32
    return %arg1, %c0_i32 : i32, i32
  }
  func.func @transform_2(%arg0: i32, %arg1: i32) -> (i32, i32) {
    %c0_i32 = arith.constant 0 : i32
    %c0_i32_0 = arith.constant 0 : i32
    return %c0_i32, %arg1 : i32, i32
  }
  func.func @transform_3(%arg0: i32, %arg1: i32) -> (i32, i32) {
    %c0_i32 = arith.constant 0 : i32
    return %arg0, %arg1 : i32, i32
  }
}

</mosaic_0001>

<bundles_post_ra>
// kernel: tpu_custom_call.1
= control target key start
LH: loop header
LB: loop body
LE: loop exit
PB: predicated region body
PF: predicated region fallthrough
CT: control target
= control target key end

     0   :  { %vm40_vm0 = vcmask 261120   ;;  %v1086_v3 = vmov 0.0   ;;  %vm1087_vm1 = vmmov 0   ;;  %s1546_s0 = inlined_call_operand.vmem [shape: f32[8,32], index: 0, kind: input, shape index: {}]   ;;  %s1547_s1 = inlined_call_operand.vmem [shape: f32[128,32], index: 1, kind: input, shape index: {}]   ;;  %s1548_s2 = inlined_call_operand.vmem [shape: f32[1,128], index: 2, kind: input, shape index: {}]   ;;  %s1549_s3 = inlined_call_operand.hbm [shape: f32[8,128], index: 3, kind: output, shape index: {}]  }
   0x1   :  { %v32_v0 = vld [vmem:[%s1547_s1 + $0x78] sm:$0xff]  ;;  %v31_v1 = vld [vmem:[%s1547_s1 + $0x70] sm:$0xff]  ;;  %v30_v2 = vld [vmem:[%s1547_s1 + $0x68] sm:$0xff]  ;;  %851 = vmatprep.subr.mxu0 %v1086_v3  ;;  %886 = vmatprep.subr.mxu1 %v1086_v3 }
   0x2   :  { %v90_v4 = vsel %vm40_vm0, %v32_v0, 0  ;;  %v87_v5 = vsel %vm40_vm0, %v31_v1, 0  ;;  %v84_v6 = vsel %vm40_vm0, %v30_v2, 0  ;;  %v29_v7 = vld [vmem:[%s1547_s1 + $0x60] sm:$0xff]  ;;  %v28_v8 = vld [vmem:[%s1547_s1 + $0x58] sm:$0xff]  ;;  %883 = vmatprep.mubr.msk.f32.mxu0 %vm1087_vm1, %v1086_v3  ;;  %918 = vmatprep.mubr.msk.f32.mxu1 %vm1087_vm1, %v1086_v3  ;;  %v27_v18 = vld [vmem:[%s1547_s1 + $0x50] sm:$0xff] }
   0x3   :  { %v1129_v9 = vand.u32 4294901760, %v90_v4  ;;  %v1131_v10 = vand.u32 4294901760, %v87_v5  ;;  %v1133_v11 = vand.u32 4294901760, %v84_v6  ;;  %v81_v12 = vsel %vm40_vm0, %v29_v7, 0 }
   0x4   :  { %v1140_v13 = vand.u32 4294901760, %v81_v12  ;;  %v78_v16 = vsel %vm40_vm0, %v28_v8, 0 }
   0x5   :  { %852 = vmatpush3.xpose.msra.mxu0 %v1129_v9  ;;  %v1144_v14 = vsub.f32 %v90_v4, %v1129_v9  ;;  %v1147_v15 = vsub.f32 %v87_v5, %v1131_v10  ;;  %v1151_v17 = vsub.f32 %v84_v6, %v1133_v11 }
   0x6   :  { %853 = vmatprep.subr.mxu0 %v1086_v3 }
   0x7   :  { %v186_v19 = vand.u32 4294901760, %v1144_v14  ;;  %v193_v20 = vand.u32 4294901760, %v1147_v15 }
   0x8   :  { %8 = vsyncpa [#allocation3], 0  ;;  %v1159_v21 = vand.u32 4294901760, %v78_v16  ;;  %v75_v22 = vsel %vm40_vm0, %v27_v18, 0  ;;  %v200_v25 = vand.u32 4294901760, %v1151_v17  ;;  %v1171_v26 = vsub.f32 %v81_v12, %v1140_v13  ;;  %v26_v27 = vld [vmem:[%s1547_s1 + $0x48] sm:$0xff] }
   0x9   :  { %854 = vmatpush3.xpose.msra.mxu0 %v1131_v10  ;;  %v187_v23 = vsub.f32 %v1144_v14, %v186_v19  ;;  %v194_v24 = vsub.f32 %v1147_v15, %v193_v20  ;;  %v1177_v29 = vand.u32 4294901760, %v75_v22  ;;  %v72_v30 = vsel %vm40_vm0, %v26_v27, 0  ;;  %v25_v35 = vld [vmem:[%s1547_s1 + $0x40] sm:$0xff]  ;;  %v24_v42 = vld [vmem:[%s1547_s1 + $0x38] sm:$0xff]  ;;  %v23_v49 = vld [vmem:[%s1547_s1 + $0x30] sm:$0xff]  ;;  %s1088_s19 = smov [#allocation2]  }
   0xa   :  { %855 = vmatprep.subr.mxu0 %v1086_v3  ;;  %v201_v32 = vsub.f32 %v1151_v17, %v200_v25  ;;  %v207_v33 = vand.u32 4294901760, %v1171_v26  ;;  %v1186_v34 = vsub.f32 %v78_v16, %v1159_v21  ;;  %v1193_v36 = vand.u32 4294901760, %v72_v30  ;;  %v22_v56 = vld [vmem:[%s1547_s1 + $0x28] sm:$0xff]  ;;  %v21_v63 = vld [vmem:[%s1547_s1 + $0x20] sm:$0xff]  ;;  %v20_v7 = vld [vmem:[%s1547_s1 + $0x18] sm:$0xff]  ;;  %s740_s20 = sshll.u32 %s1088_s19, 4  ;;  %s741_s20 = int_to_ptr.vmem [resolvable:$true] %s740_s20 }
   0xb   :  { %v188_v28 = vand.u32 4294901760, %v187_v23  ;;  %v195_v31 = vand.u32 4294901760, %v194_v24  ;;  %v1196_v37 = vsub.f32 %v75_v22, %v1177_v29  ;;  %v69_v41 = vsel %vm40_vm0, %v25_v35, 0  ;;  %v19_v24 = vld [vmem:[%s1547_s1 + $0x10] sm:$0xff]  ;;  %v15_v27 = vld [vmem:[%s1546_s0] sm:$0xff]  ;;  %p1069_p1 = scmp.lt.s32.totalorder %s741_s20, %s741_s20 }
   0xc   :  { %v202_v38 = vand.u32 4294901760, %v201_v32  ;;  %v208_v39 = vsub.f32 %v1171_v26, %v207_v33  ;;  %v214_v40 = vand.u32 4294901760, %v1186_v34  ;;  %v1209_v43 = vand.u32 4294901760, %v69_v41 }
   0xd   :  { %856 = vmatpush3.xpose.msra.mxu0 %v1133_v11  ;;  %887 = vmatpush3.xpose.msra.mxu1 %v188_v28  ;;  %v221_v44 = vand.u32 4294901760, %v1196_v37  ;;  %v66_v47 = vsel %vm40_vm0, %v24_v42, 0  ;;  %v1218_v48 = vsub.f32 %v72_v30, %v1193_v36  ;;  %v63_v54 = vsel %vm40_vm0, %v23_v49, 0 }
   0xe   :  { %857 = vmatprep.subr.mxu0 %v1086_v3  ;;  %888 = vmatprep.subr.mxu1 %v1086_v3  ;;  %v209_v45 = vand.u32 4294901760, %v208_v39  ;;  %v215_v46 = vsub.f32 %v1186_v34, %v214_v40  ;;  %v1228_v51 = vand.u32 4294901760, %v66_v47  ;;  %v1234_v55 = vsub.f32 %v69_v41, %v1209_v43  ;;  %v18_v39 = vld [vmem:[%s1547_s1 + $0x8] sm:$0xff] }
   0xf   :  { %v222_v50 = vsub.f32 %v1196_v37, %v221_v44  ;;  %v228_v53 = vand.u32 4294901760, %v1218_v48  ;;  %v1241_v57 = vand.u32 4294901760, %v63_v54  ;;  %v60_v58 = vsel %vm40_vm0, %v22_v56, 0 }
  0x10   :  { %v216_v52 = vand.u32 4294901760, %v215_v46  ;;  %v235_v61 = vand.u32 4294901760, %v1234_v55  ;;  %v1250_v62 = vsub.f32 %v66_v47, %v1228_v51  ;;  %v1257_v0 = vand.u32 4294901760, %v60_v58 }
  0x11   :  { %858 = vmatpush3.xpose.msra.mxu0 %v1140_v13  ;;  %889 = vmatpush3.xpose.msra.mxu1 %v195_v31  ;;  %v223_v59 = vand.u32 4294901760, %v222_v50  ;;  %v229_v60 = vsub.f32 %v1218_v48, %v228_v53  ;;  %v57_v1 = vsel %vm40_vm0, %v21_v63, 0  ;;  %v1266_v6 = vsub.f32 %v63_v54, %v1241_v57 }
  0x12   :  { %859 = vmatprep.subr.mxu0 %v1086_v3  ;;  %890 = vmatprep.subr.mxu1 %v1086_v3  ;;  %v236_v4 = vsub.f32 %v1234_v55, %v235_v61  ;;  %v242_v5 = vand.u32 4294901760, %v1250_v62  ;;  %v1273_v8 = vand.u32 4294901760, %v57_v1  ;;  %v54_v12 = vsel %vm40_vm0, %v20_v7, 0 }
  0x13   :  { %v230_v2 = vand.u32 4294901760, %v229_v60  ;;  %v249_v22 = vand.u32 4294901760, %v1266_v6  ;;  %v1282_v23 = vsub.f32 %v60_v58, %v1257_v0  ;;  %v1292_v28 = vand.u32 4294901760, %v54_v12 }
  0x14   :  { %v237_v16 = vand.u32 4294901760, %v236_v4  ;;  %v243_v18 = vsub.f32 %v1250_v62, %v242_v5  ;;  %v51_v30 = vsel %vm40_vm0, %v19_v24, 0  ;;  %v1296_v31 = vsub.f32 %v57_v1, %v1273_v8 }
  0x15   :  { %860 = vmatpush3.xpose.msra.mxu0 %v1159_v21  ;;  %891 = vmatpush3.xpose.msra.mxu1 %v202_v38  ;;  %v250_v35 = vsub.f32 %v1266_v6, %v249_v22  ;;  %v256_v38 = vand.u32 4294901760, %v1282_v23  ;;  %v16_v41 = vmax.f32 %v15_v27, 0.0  ;;  %v1308_v42 = vand.u32 4294901760, %v51_v30 }
  0x16   :  { %861 = vmatprep.subr.mxu0 %v1086_v3  ;;  %892 = vmatprep.subr.mxu1 %v1086_v3  ;;  %v244_v32 = vand.u32 4294901760, %v243_v18  ;;  %v48_v46 = vsel %vm40_vm0, %v18_v39, 0  ;;  %v1317_v50 = vsub.f32 %v54_v12, %v1292_v28 }
  0x17   :  { %v251_v47 = vand.u32 4294901760, %v250_v35  ;;  %v257_v49 = vsub.f32 %v1282_v23, %v256_v38  ;;  %v42_v54 = vsel %vm40_vm0, %v16_v41, 0  ;;  %v1325_v56 = vand.u32 4294901760, %v48_v46 }
  0x18   :  { %v270_v1 = vand.u32 4294901760, %v1317_v50 }
  0x19   :  { %862 = vmatpush3.xpose.msra.mxu0 %v1177_v29  ;;  %893 = vmatpush3.xpose.msra.mxu1 %v209_v45  ;;  %v263_v45 = vand.u32 4294901760, %v1296_v31  ;;  %v258_v60 = vand.u32 4294901760, %v257_v49  ;;  %v1351_v24 = vsub.f32 %v48_v46, %v1325_v56 }
  0x1a   :  { %863 = vmatprep.subr.mxu0 %v1086_v3  ;;  %894 = vmatprep.subr.mxu1 %v1086_v3 }
  0x1b   :  { %v264_v63 = vsub.f32 %v1296_v31, %v263_v45  ;;  %v284_v35 = vand.u32 4294901760, %v1351_v24 }
  0x1d   :  { %864 = vmatpush3.xpose.msra.mxu0 %v1193_v36  ;;  %895 = vmatpush3.xpose.msra.mxu1 %v216_v52  ;;  %v17_v52 = vld [vmem:[%s1547_s1] sm:$0xff]  ;;  %v265_v12 = vand.u32 4294901760, %v264_v63 }
  0x1e   :  { %865 = vmatprep.subr.mxu0 %v1086_v3  ;;  %896 = vmatprep.subr.mxu1 %v1086_v3  ;;  %v45_v58 = vsel %vm40_vm0, %v17_v52, 0 }
  0x1f   :  { %v1340_v4 = vand.u32 4294901760, %v45_v58 }
  0x21   :  { %866 = vmatpush3.xpose.msra.mxu0 %v1209_v43  ;;  %897 = vmatpush3.xpose.msra.mxu1 %v223_v59  ;;  %v1328_v59 = vand.u32 4294901760, %v42_v54  ;;  %v1362_v39 = vsub.f32 %v45_v58, %v1340_v4 }
  0x22   :  { %867 = vmatprep.subr.mxu0 %v1086_v3  ;;  %898 = vmatprep.subr.mxu1 %v1086_v3 }
  0x23   :  { %v1343_v7 = vsub.f32 %v42_v54, %v1328_v59  ;;  %v291_v49 = vand.u32 4294901760, %v1362_v39 }
  0x25   :  { %868 = vmatpush3.xpose.msra.mxu0 %v1228_v51  ;;  %899 = vmatpush3.xpose.msra.mxu1 %v230_v2  ;;  %v1336_v2 = vsub.f32 %v51_v30, %v1308_v42  ;;  %v175_v27 = vand.u32 4294901760, %v1343_v7  ;;  %v292_v58 = vsub.f32 %v1362_v39, %v291_v49 }
  0x26   :  { %869 = vmatprep.subr.mxu0 %v1086_v3  ;;  %900 = vmatprep.subr.mxu1 %v1086_v3 }
  0x27   :  { %v277_v18 = vand.u32 4294901760, %v1336_v2  ;;  %v176_v41 = vsub.f32 %v1343_v7, %v175_v27 }
  0x29   :  { %870 = vmatpush3.xpose.msra.mxu0 %v1241_v57  ;;  %901 = vmatpush3.xpose.msra.mxu1 %v237_v16  ;;  %v271_v16 = vsub.f32 %v1317_v50, %v270_v1  ;;  %v177_v52 = vand.u32 4294901760, %v176_v41 }
  0x2a   :  { %871 = vmatprep.subr.mxu0 %v1086_v3  ;;  %902 = vmatprep.subr.mxu1 %v1086_v3 }
  0x2b   :  { %v272_v30 = vand.u32 4294901760, %v271_v16 }
  0x2d   :  { %872 = vmatpush3.xpose.msra.mxu0 %v1257_v0  ;;  %903 = vmatpush3.xpose.msra.mxu1 %v244_v32  ;;  %v278_v32 = vsub.f32 %v1336_v2, %v277_v18 }
  0x2e   :  { %873 = vmatprep.subr.mxu0 %v1086_v3  ;;  %904 = vmatprep.subr.mxu1 %v1086_v3 }
  0x2f   :  { %v279_v46 = vand.u32 4294901760, %v278_v32 }
  0x31   :  { %874 = vmatpush3.xpose.msra.mxu0 %v1273_v8  ;;  %905 = vmatpush3.xpose.msra.mxu1 %v251_v47  ;;  %v285_v47 = vsub.f32 %v1351_v24, %v284_v35 }
  0x32   :  { %875 = vmatprep.subr.mxu0 %v1086_v3  ;;  %906 = vmatprep.subr.mxu1 %v1086_v3 }
  0x33   :  { %v286_v54 = vand.u32 4294901760, %v285_v47 }
  0x35   :  { %876 = vmatpush3.xpose.msra.mxu0 %v1292_v28  ;;  %907 = vmatpush3.xpose.msra.mxu1 %v258_v60  ;;  %v293_v60 = vand.u32 4294901760, %v292_v58 }
  0x36   :  { %877 = vmatprep.subr.mxu0 %v1086_v3  ;;  %908 = vmatprep.subr.mxu1 %v1086_v3 }
  0x39   :  { %878 = vmatpush3.xpose.msra.mxu0 %v1308_v42  ;;  %909 = vmatpush3.xpose.msra.mxu1 %v265_v12 }
  0x3a   :  { %879 = vmatprep.subr.mxu0 %v1086_v3  ;;  %910 = vmatprep.subr.mxu1 %v1086_v3 }
  0x3d   :  { %880 = vmatpush3.xpose.msra.mxu0 %v1325_v56  ;;  %911 = vmatpush3.xpose.msra.mxu1 %v272_v30 }
  0x3e   :  { %881 = vmatprep.subr.mxu0 %v1086_v3  ;;  %912 = vmatprep.subr.mxu1 %v1086_v3 }
  0x41   :  { %882 = vmatpush3.xpose.msra.mxu0 %v1340_v4  ;;  %913 = vmatpush3.xpose.msra.mxu1 %v279_v46 }
  0x42   :  { %914 = vmatprep.subr.mxu1 %v1086_v3  ;;  %921 = vmatprep.subr.mxu0 %v1086_v3 }
  0x44   :  { %884 = vmatmul.mubr.f32.vlgmr.msra.gmra.mxu0 %v177_v52 }
  0x45   :  { %915 = vmatpush3.xpose.msra.mxu1 %v286_v54  ;;  %922 = vmatpush3.xpose.msra.mxu0 %v1144_v14 }
  0x46   :  { %916 = vmatprep.subr.mxu1 %v1086_v3  ;;  %923 = vmatprep.subr.mxu0 %v1086_v3 }
  0x47   :  { %953 = vmatprep.mubr.msk.f32.mxu0 %vm1087_vm1, %v1086_v3 }
  0x49   :  { %917 = vmatpush3.xpose.msra.mxu1 %v293_v60  ;;  %924 = vmatpush3.xpose.msra.mxu0 %v1147_v15 }
  0x4a   :  { %925 = vmatprep.subr.mxu0 %v1086_v3  ;;  %956 = vmatprep.subr.mxu1 %v1086_v3 }
  0x4c   :  { %919 = vmatmul.mubr.f32.vlgmr.msra.gmra.mxu1 %v1328_v59 }
  0x4d   :  { %926 = vmatpush3.xpose.msra.mxu0 %v1151_v17  ;;  %957 = vmatpush3.xpose.msra.mxu1 %v1129_v9 }
  0x4e   :  { %927 = vmatprep.subr.mxu0 %v1086_v3  ;;  %958 = vmatprep.subr.mxu1 %v1086_v3 }
  0x4f   :  { %988 = vmatprep.mubr.msk.f32.mxu1 %vm1087_vm1, %v1086_v3 }
  0x51   :  { %928 = vmatpush3.xpose.msra.mxu0 %v1171_v26  ;;  %959 = vmatpush3.xpose.msra.mxu1 %v1131_v10 }
  0x52   :  { %929 = vmatprep.subr.mxu0 %v1086_v3  ;;  %960 = vmatprep.subr.mxu1 %v1086_v3 }
  0x55   :  { %930 = vmatpush3.xpose.msra.mxu0 %v1186_v34  ;;  %961 = vmatpush3.xpose.msra.mxu1 %v1133_v11 }
  0x56   :  { %931 = vmatprep.subr.mxu0 %v1086_v3  ;;  %962 = vmatprep.subr.mxu1 %v1086_v3 }
  0x59   :  { %932 = vmatpush3.xpose.msra.mxu0 %v1196_v37  ;;  %963 = vmatpush3.xpose.msra.mxu1 %v1140_v13 }
  0x5a   :  { %933 = vmatprep.subr.mxu0 %v1086_v3  ;;  %964 = vmatprep.subr.mxu1 %v1086_v3 }
  0x5d   :  { %934 = vmatpush3.xpose.msra.mxu0 %v1218_v48  ;;  %965 = vmatpush3.xpose.msra.mxu1 %v1159_v21 }
  0x5e   :  { %935 = vmatprep.subr.mxu0 %v1086_v3  ;;  %966 = vmatprep.subr.mxu1 %v1086_v3 }
  0x61   :  { %936 = vmatpush3.xpose.msra.mxu0 %v1234_v55  ;;  %967 = vmatpush3.xpose.msra.mxu1 %v1177_v29 }
  0x62   :  { %937 = vmatprep.subr.mxu0 %v1086_v3  ;;  %968 = vmatprep.subr.mxu1 %v1086_v3 }
  0x65   :  { %938 = vmatpush3.xpose.msra.mxu0 %v1250_v62  ;;  %969 = vmatpush3.xpose.msra.mxu1 %v1193_v36 }
  0x66   :  { %939 = vmatprep.subr.mxu0 %v1086_v3  ;;  %970 = vmatprep.subr.mxu1 %v1086_v3 }
  0x69   :  { %940 = vmatpush3.xpose.msra.mxu0 %v1266_v6  ;;  %971 = vmatpush3.xpose.msra.mxu1 %v1209_v43 }
  0x6a   :  { %941 = vmatprep.subr.mxu0 %v1086_v3  ;;  %972 = vmatprep.subr.mxu1 %v1086_v3 }
  0x6d   :  { %942 = vmatpush3.xpose.msra.mxu0 %v1282_v23  ;;  %973 = vmatpush3.xpose.msra.mxu1 %v1228_v51 }
  0x6e   :  { %943 = vmatprep.subr.mxu0 %v1086_v3  ;;  %974 = vmatprep.subr.mxu1 %v1086_v3 }
  0x71   :  { %944 = vmatpush3.xpose.msra.mxu0 %v1296_v31  ;;  %975 = vmatpush3.xpose.msra.mxu1 %v1241_v57 }
  0x72   :  { %945 = vmatprep.subr.mxu0 %v1086_v3  ;;  %976 = vmatprep.subr.mxu1 %v1086_v3 }
  0x75   :  { %946 = vmatpush3.xpose.msra.mxu0 %v1317_v50  ;;  %977 = vmatpush3.xpose.msra.mxu1 %v1257_v0 }
  0x76   :  { %947 = vmatprep.subr.mxu0 %v1086_v3  ;;  %978 = vmatprep.subr.mxu1 %v1086_v3 }
  0x79   :  { %948 = vmatpush3.xpose.msra.mxu0 %v1336_v2  ;;  %979 = vmatpush3.xpose.msra.mxu1 %v1273_v8 }
  0x7a   :  { %949 = vmatprep.subr.mxu0 %v1086_v3  ;;  %980 = vmatprep.subr.mxu1 %v1086_v3 }
  0x7d   :  { %950 = vmatpush3.xpose.msra.mxu0 %v1351_v24  ;;  %981 = vmatpush3.xpose.msra.mxu1 %v1292_v28 }
  0x7e   :  { %951 = vmatprep.subr.mxu0 %v1086_v3  ;;  %982 = vmatprep.subr.mxu1 %v1086_v3 }
  0x81   :  { %952 = vmatpush3.xpose.msra.mxu0 %v1362_v39  ;;  %983 = vmatpush3.xpose.msra.mxu1 %v1308_v42 }
  0x82   :  { %984 = vmatprep.subr.mxu1 %v1086_v3  ;;  %991 = vmatprep.subr.mxu0 %v1086_v3 }
  0x84   :  { %954 = vmatmul.mubr.f32.vlgmr.msra.gmra.mxu0 %v1343_v7 }
  0x85   :  { %985 = vmatpush3.xpose.msra.mxu1 %v1325_v56  ;;  %992 = vmatpush3.xpose.msra.mxu0 %v186_v19 }
  0x86   :  { %986 = vmatprep.subr.mxu1 %v1086_v3  ;;  %993 = vmatprep.subr.mxu0 %v1086_v3 }
  0x87   :  { %1023 = vmatprep.mubr.msk.f32.mxu0 %vm1087_vm1, %v1086_v3 }
  0x89   :  { %987 = vmatpush3.xpose.msra.mxu1 %v1340_v4  ;;  %994 = vmatpush3.xpose.msra.mxu0 %v193_v20 }
  0x8a   :  { %995 = vmatprep.subr.mxu0 %v1086_v3  ;;  %1026 = vmatprep.subr.mxu1 %v1086_v3 }
  0x8c   :  { %989 = vmatmul.mubr.f32.vlgmr.msra.gmra.mxu1 %v175_v27 }
  0x8d   :  { %996 = vmatpush3.xpose.msra.mxu0 %v200_v25  ;;  %1027 = vmatpush3.xpose.msra.mxu1 %v1129_v9 }
  0x8e   :  { %997 = vmatprep.subr.mxu0 %v1086_v3  ;;  %1028 = vmatprep.subr.mxu1 %v1086_v3 }
  0x8f   :  { %1058 = vmatprep.mubr.msk.f32.mxu1 %vm1087_vm1, %v1086_v3 }
  0x91   :  { %998 = vmatpush3.xpose.msra.mxu0 %v207_v33  ;;  %1029 = vmatpush3.xpose.msra.mxu1 %v1131_v10  ;;  %v748_v10 = vld [vmem:[%s1548_s2] ss:$0 sm:$0xff]  ;;  %s1064_s2 = scalar_lea.vmem %s741_s20, 128 }
  0x92   :  { %999 = vmatprep.subr.mxu0 %v1086_v3  ;;  %1030 = vmatprep.subr.mxu1 %v1086_v3  ;;  %p1065_p0 = scmp.ne.s32.totalorder %s741_s20, %s1064_s2  ;;  %p1070_p2 = scmp.lt.s32.totalorder %s1064_s2, %s1064_s2 }
  0x94   :  { %p1071_p3 = por %p1070_p2, %p1069_p1 }
  0x95   :  { %1000 = vmatpush3.xpose.msra.mxu0 %v214_v40  ;;  %1031 = vmatpush3.xpose.msra.mxu1 %v1133_v11 }
  0x96   :  { %1001 = vmatprep.subr.mxu0 %v1086_v3  ;;  %1032 = vmatprep.subr.mxu1 %v1086_v3  ;;  %p1072_p4 = pnand %p1071_p3, %p1065_p0 }
  0x99   :  { %1002 = vmatpush3.xpose.msra.mxu0 %v221_v44  ;;  %1033 = vmatpush3.xpose.msra.mxu1 %v1140_v13 }
  0x9a   :  { %1003 = vmatprep.subr.mxu0 %v1086_v3  ;;  %1034 = vmatprep.subr.mxu1 %v1086_v3 }
  0x9d   :  { %1004 = vmatpush3.xpose.msra.mxu0 %v228_v53  ;;  %1035 = vmatpush3.xpose.msra.mxu1 %v1159_v21 }
  0x9e   :  { %1005 = vmatprep.subr.mxu0 %v1086_v3  ;;  %1036 = vmatprep.subr.mxu1 %v1086_v3 }
  0xa1   :  { %1006 = vmatpush3.xpose.msra.mxu0 %v235_v61  ;;  %1037 = vmatpush3.xpose.msra.mxu1 %v1177_v29 }
  0xa2   :  { %1007 = vmatprep.subr.mxu0 %v1086_v3  ;;  %1038 = vmatprep.subr.mxu1 %v1086_v3 }
  0xa5   :  { %1008 = vmatpush3.xpose.msra.mxu0 %v242_v5  ;;  %1039 = vmatpush3.xpose.msra.mxu1 %v1193_v36 }
  0xa6   :  { %1009 = vmatprep.subr.mxu0 %v1086_v3  ;;  %1040 = vmatprep.subr.mxu1 %v1086_v3 }
  0xa9   :  { %1010 = vmatpush3.xpose.msra.mxu0 %v249_v22  ;;  %1041 = vmatpush3.xpose.msra.mxu1 %v1209_v43 }
  0xaa   :  { %1011 = vmatprep.subr.mxu0 %v1086_v3  ;;  %1042 = vmatprep.subr.mxu1 %v1086_v3 }
  0xad   :  { %1012 = vmatpush3.xpose.msra.mxu0 %v256_v38  ;;  %1043 = vmatpush3.xpose.msra.mxu1 %v1228_v51 }
  0xae   :  { %1013 = vmatprep.subr.mxu0 %v1086_v3  ;;  %1044 = vmatprep.subr.mxu1 %v1086_v3 }
  0xb1   :  { %1014 = vmatpush3.xpose.msra.mxu0 %v263_v45  ;;  %1045 = vmatpush3.xpose.msra.mxu1 %v1241_v57 }
  0xb2   :  { %1015 = vmatprep.subr.mxu0 %v1086_v3  ;;  %1046 = vmatprep.subr.mxu1 %v1086_v3 }
  0xb5   :  { %1016 = vmatpush3.xpose.msra.mxu0 %v270_v1  ;;  %1047 = vmatpush3.xpose.msra.mxu1 %v1257_v0 }
  0xb6   :  { %1017 = vmatprep.subr.mxu0 %v1086_v3  ;;  %1048 = vmatprep.subr.mxu1 %v1086_v3 }
  0xb9   :  { %1018 = vmatpush3.xpose.msra.mxu0 %v277_v18  ;;  %1049 = vmatpush3.xpose.msra.mxu1 %v1273_v8 }
  0xba   :  { %1019 = vmatprep.subr.mxu0 %v1086_v3  ;;  %1050 = vmatprep.subr.mxu1 %v1086_v3 }
  0xbd   :  { %1020 = vmatpush3.xpose.msra.mxu0 %v284_v35  ;;  %1051 = vmatpush3.xpose.msra.mxu1 %v1292_v28 }
  0xbe   :  { %1021 = vmatprep.subr.mxu0 %v1086_v3  ;;  %1052 = vmatprep.subr.mxu1 %v1086_v3 }
  0xc1   :  { %1022 = vmatpush3.xpose.msra.mxu0 %v291_v49  ;;  %1053 = vmatpush3.xpose.msra.mxu1 %v1308_v42 }
  0xc2   :  { %1054 = vmatprep.subr.mxu1 %v1086_v3 }
  0xc4   :  { %1024 = vmatmul.mubr.f32.vlgmr.msra.gmra.mxu0 %v1328_v59 }
  0xc5   :  { %1055 = vmatpush3.xpose.msra.mxu1 %v1325_v56 }
  0xc6   :  { %1056 = vmatprep.subr.mxu1 %v1086_v3 }
  0xc9   :  { %1057 = vmatpush3.xpose.msra.mxu1 %v1340_v4 }
  0xcc   :  { %1059 = vmatmul.mubr.f32.vlgmr.msra.gmra.mxu1 %v1328_v59 }
 0x104   :  { %v179_v9 = vpop.f32.mrf.mxu0 }
 0x105   :  { %v180_v13 = vadd.f32 %v748_v10, %v179_v9 }
 0x106   :  { %v885_v11 = vpop.f32.mrf.mxu0 }
 0x10c   :  { %v330_v14 = vpop.f32.mrf.mxu1 }
 0x10d   :  { %v331_v15 = vadd.f32 %v330_v14, %v180_v13 }
 0x10e   :  { %v920_v17 = vpop.f32.mrf.mxu1 }
 0x144   :  { %v434_v19 = vpop.f32.mrf.mxu0 }
 0x145   :  { %v435_v20 = vadd.f32 %v434_v19, %v331_v15 }
 0x146   :  { %v955_v21 = vpop.f32.mrf.mxu0 }
 0x14c   :  { %v523_v25 = vpop.f32.mrf.mxu1 }
 0x14d   :  { %v524_v33 = vadd.f32 %v523_v25, %v435_v20 }
 0x14e   :  { %v990_v26 = vpop.f32.mrf.mxu1 }
 0x184   :  { %v642_v3 = vpop.f32.mrf.mxu0 }
 0x185   :  { %v643_v34 = vadd.f32 %v642_v3, %v524_v33 }
 0x186   :  { %v1025_v29 = vpop.f32.mrf.mxu0 }
 0x18c   :  { %v729_v36 = vpop.f32.mrf.mxu1 }
 0x18d   :  { %v730_v37 = vadd.f32 %v729_v36, %v643_v34 }
 0x18e   :  { %v1060_v40 = vpop.f32.mrf.mxu1 }
 0x18f   :  { %733 = vst [vmem:[#allocation2] sm:$0xff] %v730_v37 }
 0x190   :  { %1075 = shalt.err (!%p1072_p4)
}
 0x191   :  { %743 = dma.vmem_to_hbm [thread:$0]  %s741_s20, 128, %s1549_s3, [#allocation3]  }
 0x192   :  { %1084 = dma.done.wait [#allocation3], 128  }
 0x193   :  { %1085 = vsyncadd [#allocation3], 4294967168 }
 0x194   :  { %747 = vsyncpa [#allocation3], 1 }

</bundles_post_ra>
